<compile_context>
chip_gen: v6e
topology: v6e:2x2x1
jax: 0.10.0
libtpu: 0.0.40
codegen_flags: <defaults>
</compile_context>

<pallas_src>
import functools

import jax
import jax.numpy as jnp
from jax.experimental import pallas as pl
from jax.experimental.pallas import tpu as pltpu

_LANE = 128


def _dw_conv3x3(x_ref, w_ref, xp_ref):
    """3x3 depthwise conv (stride 1, pad 1) of one (1, H, W, Ct) block.

    Zero padding lives in the VMEM halo scratch `xp_ref` ((H+2, W+2, Ct)).
    Only the 1-pixel border is zeroed (interior is fully overwritten).
    Returns the f32 conv block of shape (H, W, Ct).
    """
    H, W, Ct = x_ref.shape[1], x_ref.shape[2], x_ref.shape[3]
    # Zero only the border rows/cols of the halo (cheap; interior overwritten).
    xp_ref[pl.ds(0, 1), :, :] = jnp.zeros((1, W + 2, Ct), jnp.float32)
    xp_ref[pl.ds(H + 1, 1), :, :] = jnp.zeros((1, W + 2, Ct), jnp.float32)
    xp_ref[pl.ds(1, H), pl.ds(0, 1), :] = jnp.zeros((H, 1, Ct), jnp.float32)
    xp_ref[pl.ds(1, H), pl.ds(W + 1, 1), :] = jnp.zeros((H, 1, Ct), jnp.float32)
    xp_ref[pl.ds(1, H), pl.ds(1, W), :] = x_ref[0].astype(jnp.float32)

    xp = xp_ref[...]
    # Build the 3 W-shifted (sublane-axis) planes once; reuse across kh taps.
    xs = [xp[:, kw:kw + W, :] for kw in range(3)]        # each (H+2, W, Ct)
    acc = jnp.zeros((H, W, Ct), jnp.float32)
    for kh in range(3):
        for kw in range(3):
            # Leading-dim slice of xs[kw] is plain addressing (no relayout).
            acc = acc + xs[kw][kh:kh + H] * w_ref[kh, kw, :].astype(jnp.float32)
    return acc


def _fused_kernel(x_ref, w_ref, gamma_ref, beta_ref, y_ref,
                  conv_sc, sum_sc, sq_sc, xp_sc, *, n_batch, eps):
    """Grid = (channel_blocks [parallel], N [arbitrary, innermost]).

    Per step: depthwise conv of one (batch, channel-block), cache it in VMEM,
    accumulate per-channel sum / sum-of-squares.  On the last batch step,
    compute the BN affine and write all y blocks for this channel block.
    """
    n = pl.program_id(1)

    @pl.when(n == 0)
    def _init():
        sum_sc[...] = jnp.zeros_like(sum_sc)
        sq_sc[...] = jnp.zeros_like(sq_sc)

    H, W = x_ref.shape[1], x_ref.shape[2]
    conv = _dw_conv3x3(x_ref, w_ref, xp_sc)              # (H, W, Ct) f32
    conv_sc[n] = conv
    sum_sc[0, :] += jnp.sum(conv, axis=(0, 1))
    sq_sc[0, :] += jnp.sum(conv * conv, axis=(0, 1))

    @pl.when(n == n_batch - 1)
    def _finalize():
        inv_cnt = jnp.float32(1.0 / float(n_batch * H * W))
        mean = sum_sc[0, :] * inv_cnt
        # E[x^2] - mean^2 in f32; clamp at 0 (see precision caveat above).
        var = jnp.maximum(sq_sc[0, :] * inv_cnt - mean * mean, 0.0)
        scale = gamma_ref[0, :] * jax.lax.rsqrt(var + jnp.float32(eps))
        bias = beta_ref[0, :] - mean * scale
        y_ref[...] = (conv_sc[...] * scale + bias).astype(y_ref.dtype)


def depthwise_conv_bn(x_nchw, w_dw, gamma, beta, eps=1e-3, block_c=None):
    """x_nchw: (N, C, H, W) f32; w_dw: (C, 1, 3, 3) depthwise weight."""
    N, C, H, W = x_nchw.shape

    # Auto-pick block_c: lane multiple, targeting ~2 parallel channel blocks
    # (>=2 parallel grid steps so v7x's two TensorCores both get work).
    c128 = -(-C // _LANE) * _LANE
    if block_c is None:
        block_c = _LANE * max(1, -(-(c128 // _LANE) // 2))
    assert block_c % _LANE == 0
    c_pad = -(-C // block_c) * block_c
    n_cb = c_pad // block_c

    # NCHW -> NHWC (+ channel pad); XLA fuses these copies.
    # TODO(synk): drop this transpose pair if the model is already NHWC.
    x = jnp.transpose(x_nchw, (0, 2, 3, 1))
    w = jnp.transpose(w_dw.reshape(C, 3, 3), (1, 2, 0))          # (3, 3, C)
    gamma_p, beta_p = gamma, beta
    if c_pad != C:
        pc = c_pad - C
        x = jnp.pad(x, ((0, 0), (0, 0), (0, 0), (0, pc)))
        w = jnp.pad(w, ((0, 0), (0, 0), (0, pc)))
        gamma_p = jnp.pad(gamma, (0, pc))
        beta_p = jnp.pad(beta, (0, pc))

    # VMEM budget from the actual tile footprint (+3x headroom, 8 MiB floor).
    f32 = 4
    est = (2 * (H * W * block_c) * f32                 # x (double-buffered)
           + 2 * (N * H * W * block_c) * f32           # y block (resident)
           + 2 * (9 + 4) * block_c * f32               # w, gamma, beta
           + (N * H * W * block_c + 2 * block_c) * f32  # conv cache + stats
           + (H + 2) * (W + 2) * block_c * f32)        # halo scratch
    vmem_limit = int(min(max(3 * est, 8 * 2 ** 20), 64 * 2 ** 20))

    grid = (n_cb, N)                                    # N innermost (fastest)
    x_spec = pl.BlockSpec((1, H, W, block_c), lambda cb, n: (n, 0, 0, cb))
    w_spec = pl.BlockSpec((3, 3, block_c), lambda cb, n: (0, 0, cb))
    vec_spec = pl.BlockSpec((1, block_c), lambda cb, n: (0, cb))
    y_spec = pl.BlockSpec((N, H, W, block_c), lambda cb, n: (0, 0, 0, cb))

    kernel = functools.partial(_fused_kernel, n_batch=N, eps=eps)
    y = pl.pallas_call(
        kernel,
        out_shape=jax.ShapeDtypeStruct((N, H, W, c_pad), jnp.float32),
        grid_spec=pltpu.PrefetchScalarGridSpec(
            num_scalar_prefetch=0, grid=grid,
            in_specs=[x_spec, w_spec, vec_spec, vec_spec],
            out_specs=y_spec,
            scratch_shapes=[
                pltpu.VMEM((N, H, W, block_c), jnp.float32),       # conv cache
                pltpu.VMEM((1, block_c), jnp.float32),             # sum
                pltpu.VMEM((1, block_c), jnp.float32),             # sum of sq
                pltpu.VMEM((H + 2, W + 2, block_c), jnp.float32),  # halo
            ]),
        compiler_params=pltpu.CompilerParams(
            dimension_semantics=("parallel", "arbitrary"),
            vmem_limit_bytes=vmem_limit),
    )(x, w, gamma_p[None, :], beta_p[None, :])

    y = y[..., :C]
    return jnp.transpose(y, (0, 3, 1, 2))               # NHWC -> NCHW


def _reference(x_nchw, w_dw, gamma, beta, eps=1e-3):
    """Pure-JAX reference of the PyTorch forward (training-mode BN)."""
    N, C, H, W = x_nchw.shape
    x = jnp.transpose(x_nchw, (0, 2, 3, 1))
    xp = jnp.pad(x, ((0, 0), (1, 1), (1, 1), (0, 0)))
    w = jnp.transpose(w_dw.reshape(C, 3, 3), (1, 2, 0))
    conv = jnp.zeros((N, H, W, C), jnp.float32)
    for kh in range(3):
        for kw in range(3):
            conv = conv + xp[:, kh:kh + H, kw:kw + W, :] * w[kh, kw, :]
    mean = jnp.mean(conv, axis=(0, 1, 2))
    var = jnp.var(conv, axis=(0, 1, 2))
    y = (conv - mean) / jnp.sqrt(var + eps) * gamma + beta
    return jnp.transpose(y, (0, 3, 1, 2))


if __name__ == "__main__":
    # Small shapes consistent with the module's depthwise structure
    # (module is N=1, C=1824, H=W=7).  C=200 exercises the channel padding
    # (-> 256) and two parallel channel blocks; N=2 exercises the inner
    # "arbitrary" batch axis (stats accumulation + deferred y write).
    N, C, H, W = 2, 200, 7, 7

    key = jax.random.PRNGKey(0)
    kx, kw, kg, kb = jax.random.split(key, 4)
    x = jax.random.normal(kx, (N, C, H, W), dtype=jnp.float32)
    w_dw = 0.1 * jax.random.normal(kw, (C, 1, 3, 3), dtype=jnp.float32)   # depthwise weight
    gamma = 1.0 + 0.1 * jax.random.normal(kg, (C,), dtype=jnp.float32)    # BN weight
    beta = 0.1 * jax.random.normal(kb, (C,), dtype=jnp.float32)           # BN bias

    fwd = jax.jit(functools.partial(depthwise_conv_bn, eps=1e-3))
    out = jax.block_until_ready(fwd(x, w_dw, gamma, beta))

    ref = _reference(x, w_dw, gamma, beta, eps=1e-3)
    assert out.shape == (N, C, H, W)
    err = float(jnp.max(jnp.abs(out - ref)))
    assert jnp.allclose(out, ref, atol=1e-4, rtol=1e-4), f"max abs err {err}"

    print("KERNEL_OK")
</pallas_src>

<mosaic_0001>
module attributes {stable_mosaic.version = 11 : i64} {
  func.func @_fused_kernel(%arg0: i32, %arg1: i32, %arg2: memref<1x7x7x128xf32, #tpu.memory_space<vmem>>, %arg3: memref<3x3x128xf32, #tpu.memory_space<vmem>>, %arg4: memref<1x128xf32, #tpu.memory_space<vmem>>, %arg5: memref<1x128xf32, #tpu.memory_space<vmem>>, %arg6: memref<2x7x7x128xf32, #tpu.memory_space<vmem>>, %arg7: memref<2x7x7x128xf32, #tpu.memory_space<vmem>>, %arg8: memref<1x128xf32, #tpu.memory_space<vmem>>, %arg9: memref<1x128xf32, #tpu.memory_space<vmem>>, %arg10: memref<9x9x128xf32, #tpu.memory_space<vmem>>) attributes {dimension_semantics = [#tpu.dimension_semantics<parallel>, #tpu.dimension_semantics<arbitrary>], iteration_bounds = array<i64: 2, 2>, scalar_prefetch = 0 : i64, scratch_operands = 4 : i64, tpu.core_type = #tpu.core_type<tc>, window_params = [{transform_indices = @transform_0, window_bounds = array<i64: 1, 7, 7, 128>}, {transform_indices = @transform_1, window_bounds = array<i64: 3, 3, 128>}, {transform_indices = @transform_2, window_bounds = array<i64: 1, 128>}, {transform_indices = @transform_3, window_bounds = array<i64: 1, 128>}, {transform_indices = @transform_4, window_bounds = array<i64: 2, 7, 7, 128>}]} {
    %c0_i32 = arith.constant 0 : i32
    %0 = arith.cmpi eq, %arg1, %c0_i32 : i32
    %1 = arith.extui %0 : i1 to i32
    %c0_i32_0 = arith.constant 0 : i32
    %2 = arith.cmpi ne, %1, %c0_i32_0 : i32
    scf.if %2 {
      %cst_64 = arith.constant 0.000000e+00 : f32
      %104 = vector.broadcast %cst_64 : f32 to vector<1x128xf32>
      %c0_65 = arith.constant 0 : index
      %c0_66 = arith.constant 0 : index
      %105 = vector.load %arg8[%c0_65, %c0_66] : memref<1x128xf32, #tpu.memory_space<vmem>>, vector<1x128xf32>
      tpu.vector_store %arg8[%c0_65, %c0_66], %104 {strides = array<i32>} : memref<1x128xf32, #tpu.memory_space<vmem>>, vector<1x128xf32>,
      %cst_67 = arith.constant 0.000000e+00 : f32
      %106 = vector.broadcast %cst_67 : f32 to vector<1x128xf32>
      %c0_68 = arith.constant 0 : index
      %c0_69 = arith.constant 0 : index
      %107 = vector.load %arg9[%c0_68, %c0_69] : memref<1x128xf32, #tpu.memory_space<vmem>>, vector<1x128xf32>
      tpu.vector_store %arg9[%c0_68, %c0_69], %106 {strides = array<i32>} : memref<1x128xf32, #tpu.memory_space<vmem>>, vector<1x128xf32>,
    } else {
    }
    %cst = arith.constant 0.000000e+00 : f32
    %3 = vector.broadcast %cst : f32 to vector<1x9x128xf32>
    %c0 = arith.constant 0 : index
    %c0_1 = arith.constant 0 : index
    %c0_2 = arith.constant 0 : index
    %4 = vector.load %arg10[%c0, %c0_1, %c0_2] : memref<9x9x128xf32, #tpu.memory_space<vmem>>, vector<1x9x128xf32>
    tpu.vector_store %arg10[%c0, %c0_1, %c0_2], %3 {strides = array<i32>} : memref<9x9x128xf32, #tpu.memory_space<vmem>>, vector<1x9x128xf32>,
    %cst_3 = arith.constant 0.000000e+00 : f32
    %5 = vector.broadcast %cst_3 : f32 to vector<1x9x128xf32>
    %c8 = arith.constant 8 : index
    %c0_4 = arith.constant 0 : index
    %c0_5 = arith.constant 0 : index
    %6 = vector.load %arg10[%c8, %c0_4, %c0_5] : memref<9x9x128xf32, #tpu.memory_space<vmem>>, vector<1x9x128xf32>
    tpu.vector_store %arg10[%c8, %c0_4, %c0_5], %5 {strides = array<i32>} : memref<9x9x128xf32, #tpu.memory_space<vmem>>, vector<1x9x128xf32>,
    %cst_6 = arith.constant 0.000000e+00 : f32
    %7 = vector.broadcast %cst_6 : f32 to vector<7x1x128xf32>
    %c1 = arith.constant 1 : index
    %c0_7 = arith.constant 0 : index
    %c0_8 = arith.constant 0 : index
    %8 = vector.load %arg10[%c1, %c0_7, %c0_8] : memref<9x9x128xf32, #tpu.memory_space<vmem>>, vector<7x1x128xf32>
    tpu.vector_store %arg10[%c1, %c0_7, %c0_8], %7 {strides = array<i32>} : memref<9x9x128xf32, #tpu.memory_space<vmem>>, vector<7x1x128xf32>,
    %cst_9 = arith.constant 0.000000e+00 : f32
    %9 = vector.broadcast %cst_9 : f32 to vector<7x1x128xf32>
    %c1_10 = arith.constant 1 : index
    %c8_11 = arith.constant 8 : index
    %c0_12 = arith.constant 0 : index
    %10 = vector.load %arg10[%c1_10, %c8_11, %c0_12] : memref<9x9x128xf32, #tpu.memory_space<vmem>>, vector<7x1x128xf32>
    tpu.vector_store %arg10[%c1_10, %c8_11, %c0_12], %9 {strides = array<i32>} : memref<9x9x128xf32, #tpu.memory_space<vmem>>, vector<7x1x128xf32>,
    %c0_13 = arith.constant 0 : index
    %c0_14 = arith.constant 0 : index
    %c0_15 = arith.constant 0 : index
    %c0_16 = arith.constant 0 : index
    %11 = vector.load %arg2[%c0_13, %c0_14, %c0_15, %c0_16] : memref<1x7x7x128xf32, #tpu.memory_space<vmem>>, vector<1x7x7x128xf32>
    %12 = vector.shape_cast %11 : vector<1x7x7x128xf32> to vector<7x7x128xf32>
    %c1_17 = arith.constant 1 : index
    %c1_18 = arith.constant 1 : index
    %c0_19 = arith.constant 0 : index
    %13 = vector.load %arg10[%c1_17, %c1_18, %c0_19] : memref<9x9x128xf32, #tpu.memory_space<vmem>>, vector<7x7x128xf32>
    tpu.vector_store %arg10[%c1_17, %c1_18, %c0_19], %12 {strides = array<i32>} : memref<9x9x128xf32, #tpu.memory_space<vmem>>, vector<7x7x128xf32>,
    %c0_20 = arith.constant 0 : index
    %c0_21 = arith.constant 0 : index
    %c0_22 = arith.constant 0 : index
    %14 = vector.load %arg10[%c0_20, %c0_21, %c0_22] : memref<9x9x128xf32, #tpu.memory_space<vmem>>, vector<9x9x128xf32>
    %15 = vector.extract_strided_slice %14 {offsets = [0, 0, 0], sizes = [9, 7, 128], strides = [1, 1, 1]} : vector<9x9x128xf32> to vector<9x7x128xf32>
    %16 = vector.extract_strided_slice %14 {offsets = [0, 1, 0], sizes = [9, 7, 128], strides = [1, 1, 1]} : vector<9x9x128xf32> to vector<9x7x128xf32>
    %17 = vector.extract_strided_slice %14 {offsets = [0, 2, 0], sizes = [9, 7, 128], strides = [1, 1, 1]} : vector<9x9x128xf32> to vector<9x7x128xf32>
    %cst_23 = arith.constant 0.000000e+00 : f32
    %18 = vector.broadcast %cst_23 : f32 to vector<7x7x128xf32>
    %19 = vector.extract_strided_slice %15 {offsets = [0, 0, 0], sizes = [7, 7, 128], strides = [1, 1, 1]} : vector<9x7x128xf32> to vector<7x7x128xf32>
    %c0_24 = arith.constant 0 : index
    %c0_25 = arith.constant 0 : index
    %c0_26 = arith.constant 0 : index
    %20 = vector.load %arg3[%c0_24, %c0_25, %c0_26] : memref<3x3x128xf32, #tpu.memory_space<vmem>>, vector<1x1x128xf32>
    %21 = vector.shape_cast %20 : vector<1x1x128xf32> to vector<128xf32>
    %22 = vector.shape_cast %21 : vector<128xf32> to vector<1x1x128xf32>
    %23 = vector.broadcast %22 : vector<1x1x128xf32> to vector<7x7x128xf32>
    %24 = arith.mulf %19, %23 : vector<7x7x128xf32>
    %25 = arith.addf %18, %24 : vector<7x7x128xf32>
    %26 = vector.extract_strided_slice %16 {offsets = [0, 0, 0], sizes = [7, 7, 128], strides = [1, 1, 1]} : vector<9x7x128xf32> to vector<7x7x128xf32>
    %c0_27 = arith.constant 0 : index
    %c1_28 = arith.constant 1 : index
    %c0_29 = arith.constant 0 : index
    %27 = vector.load %arg3[%c0_27, %c1_28, %c0_29] : memref<3x3x128xf32, #tpu.memory_space<vmem>>, vector<1x1x128xf32>
    %28 = vector.shape_cast %27 : vector<1x1x128xf32> to vector<128xf32>
    %29 = vector.shape_cast %28 : vector<128xf32> to vector<1x1x128xf32>
    %30 = vector.broadcast %29 : vector<1x1x128xf32> to vector<7x7x128xf32>
    %31 = arith.mulf %26, %30 : vector<7x7x128xf32>
    %32 = arith.addf %25, %31 : vector<7x7x128xf32>
    %33 = vector.extract_strided_slice %17 {offsets = [0, 0, 0], sizes = [7, 7, 128], strides = [1, 1, 1]} : vector<9x7x128xf32> to vector<7x7x128xf32>
    %c0_30 = arith.constant 0 : index
    %c2 = arith.constant 2 : index
    %c0_31 = arith.constant 0 : index
    %34 = vector.load %arg3[%c0_30, %c2, %c0_31] : memref<3x3x128xf32, #tpu.memory_space<vmem>>, vector<1x1x128xf32>
    %35 = vector.shape_cast %34 : vector<1x1x128xf32> to vector<128xf32>
    %36 = vector.shape_cast %35 : vector<128xf32> to vector<1x1x128xf32>
    %37 = vector.broadcast %36 : vector<1x1x128xf32> to vector<7x7x128xf32>
    %38 = arith.mulf %33, %37 : vector<7x7x128xf32>
    %39 = arith.addf %32, %38 : vector<7x7x128xf32>
    %40 = vector.extract_strided_slice %15 {offsets = [1, 0, 0], sizes = [7, 7, 128], strides = [1, 1, 1]} : vector<9x7x128xf32> to vector<7x7x128xf32>
    %c1_32 = arith.constant 1 : index
    %c0_33 = arith.constant 0 : index
    %c0_34 = arith.constant 0 : index
    %41 = vector.load %arg3[%c1_32, %c0_33, %c0_34] : memref<3x3x128xf32, #tpu.memory_space<vmem>>, vector<1x1x128xf32>
    %42 = vector.shape_cast %41 : vector<1x1x128xf32> to vector<128xf32>
    %43 = vector.shape_cast %42 : vector<128xf32> to vector<1x1x128xf32>
    %44 = vector.broadcast %43 : vector<1x1x128xf32> to vector<7x7x128xf32>
    %45 = arith.mulf %40, %44 : vector<7x7x128xf32>
    %46 = arith.addf %39, %45 : vector<7x7x128xf32>
    %47 = vector.extract_strided_slice %16 {offsets = [1, 0, 0], sizes = [7, 7, 128], strides = [1, 1, 1]} : vector<9x7x128xf32> to vector<7x7x128xf32>
    %c1_35 = arith.constant 1 : index
    %c1_36 = arith.constant 1 : index
    %c0_37 = arith.constant 0 : index
    %48 = vector.load %arg3[%c1_35, %c1_36, %c0_37] : memref<3x3x128xf32, #tpu.memory_space<vmem>>, vector<1x1x128xf32>
    %49 = vector.shape_cast %48 : vector<1x1x128xf32> to vector<128xf32>
    %50 = vector.shape_cast %49 : vector<128xf32> to vector<1x1x128xf32>
    %51 = vector.broadcast %50 : vector<1x1x128xf32> to vector<7x7x128xf32>
    %52 = arith.mulf %47, %51 : vector<7x7x128xf32>
    %53 = arith.addf %46, %52 : vector<7x7x128xf32>
    %54 = vector.extract_strided_slice %17 {offsets = [1, 0, 0], sizes = [7, 7, 128], strides = [1, 1, 1]} : vector<9x7x128xf32> to vector<7x7x128xf32>
    %c1_38 = arith.constant 1 : index
    %c2_39 = arith.constant 2 : index
    %c0_40 = arith.constant 0 : index
    %55 = vector.load %arg3[%c1_38, %c2_39, %c0_40] : memref<3x3x128xf32, #tpu.memory_space<vmem>>, vector<1x1x128xf32>
    %56 = vector.shape_cast %55 : vector<1x1x128xf32> to vector<128xf32>
    %57 = vector.shape_cast %56 : vector<128xf32> to vector<1x1x128xf32>
    %58 = vector.broadcast %57 : vector<1x1x128xf32> to vector<7x7x128xf32>
    %59 = arith.mulf %54, %58 : vector<7x7x128xf32>
    %60 = arith.addf %53, %59 : vector<7x7x128xf32>
    %61 = vector.extract_strided_slice %15 {offsets = [2, 0, 0], sizes = [7, 7, 128], strides = [1, 1, 1]} : vector<9x7x128xf32> to vector<7x7x128xf32>
    %c2_41 = arith.constant 2 : index
    %c0_42 = arith.constant 0 : index
    %c0_43 = arith.constant 0 : index
    %62 = vector.load %arg3[%c2_41, %c0_42, %c0_43] : memref<3x3x128xf32, #tpu.memory_space<vmem>>, vector<1x1x128xf32>
    %63 = vector.shape_cast %62 : vector<1x1x128xf32> to vector<128xf32>
    %64 = vector.shape_cast %63 : vector<128xf32> to vector<1x1x128xf32>
    %65 = vector.broadcast %64 : vector<1x1x128xf32> to vector<7x7x128xf32>
    %66 = arith.mulf %61, %65 : vector<7x7x128xf32>
    %67 = arith.addf %60, %66 : vector<7x7x128xf32>
    %68 = vector.extract_strided_slice %16 {offsets = [2, 0, 0], sizes = [7, 7, 128], strides = [1, 1, 1]} : vector<9x7x128xf32> to vector<7x7x128xf32>
    %c2_44 = arith.constant 2 : index
    %c1_45 = arith.constant 1 : index
    %c0_46 = arith.constant 0 : index
    %69 = vector.load %arg3[%c2_44, %c1_45, %c0_46] : memref<3x3x128xf32, #tpu.memory_space<vmem>>, vector<1x1x128xf32>
    %70 = vector.shape_cast %69 : vector<1x1x128xf32> to vector<128xf32>
    %71 = vector.shape_cast %70 : vector<128xf32> to vector<1x1x128xf32>
    %72 = vector.broadcast %71 : vector<1x1x128xf32> to vector<7x7x128xf32>
    %73 = arith.mulf %68, %72 : vector<7x7x128xf32>
    %74 = arith.addf %67, %73 : vector<7x7x128xf32>
    %75 = vector.extract_strided_slice %17 {offsets = [2, 0, 0], sizes = [7, 7, 128], strides = [1, 1, 1]} : vector<9x7x128xf32> to vector<7x7x128xf32>
    %c2_47 = arith.constant 2 : index
    %c2_48 = arith.constant 2 : index
    %c0_49 = arith.constant 0 : index
    %76 = vector.load %arg3[%c2_47, %c2_48, %c0_49] : memref<3x3x128xf32, #tpu.memory_space<vmem>>, vector<1x1x128xf32>
    %77 = vector.shape_cast %76 : vector<1x1x128xf32> to vector<128xf32>
    %78 = vector.shape_cast %77 : vector<128xf32> to vector<1x1x128xf32>
    %79 = vector.broadcast %78 : vector<1x1x128xf32> to vector<7x7x128xf32>
    %80 = arith.mulf %75, %79 : vector<7x7x128xf32>
    %81 = arith.addf %74, %80 : vector<7x7x128xf32>
    %82 = arith.index_cast %arg1 : i32 to index
    %c0_50 = arith.constant 0 : index
    %c0_51 = arith.constant 0 : index
    %c0_52 = arith.constant 0 : index
    %83 = vector.load %arg7[%82, %c0_50, %c0_51, %c0_52] : memref<2x7x7x128xf32, #tpu.memory_space<vmem>>, vector<1x7x7x128xf32>
    %84 = vector.shape_cast %83 : vector<1x7x7x128xf32> to vector<7x7x128xf32>
    %85 = vector.shape_cast %81 : vector<7x7x128xf32> to vector<1x7x7x128xf32>
    tpu.vector_store %arg7[%82, %c0_50, %c0_51, %c0_52], %85 {strides = array<i32>} : memref<2x7x7x128xf32, #tpu.memory_space<vmem>>, vector<1x7x7x128xf32>,
    %c0_53 = arith.constant 0 : index
    %c0_54 = arith.constant 0 : index
    %86 = vector.load %arg8[%c0_53, %c0_54] : memref<1x128xf32, #tpu.memory_space<vmem>>, vector<1x128xf32>
    %87 = vector.shape_cast %86 : vector<1x128xf32> to vector<128xf32>
    %cst_55 = arith.constant dense<0.000000e+00> : vector<128xf32>
    %88 = vector.multi_reduction <add>, %81, %cst_55 [0, 1] : vector<7x7x128xf32> to vector<128xf32>
    %89 = arith.addf %87, %88 : vector<128xf32>
    %c0_56 = arith.constant 0 : index
    %c0_57 = arith.constant 0 : index
    %90 = vector.load %arg8[%c0_56, %c0_57] : memref<1x128xf32, #tpu.memory_space<vmem>>, vector<1x128xf32>
    %91 = vector.shape_cast %90 : vector<1x128xf32> to vector<128xf32>
    %92 = vector.shape_cast %89 : vector<128xf32> to vector<1x128xf32>
    tpu.vector_store %arg8[%c0_56, %c0_57], %92 {strides = array<i32>} : memref<1x128xf32, #tpu.memory_space<vmem>>, vector<1x128xf32>,
    %c0_58 = arith.constant 0 : index
    %c0_59 = arith.constant 0 : index
    %93 = vector.load %arg9[%c0_58, %c0_59] : memref<1x128xf32, #tpu.memory_space<vmem>>, vector<1x128xf32>
    %94 = vector.shape_cast %93 : vector<1x128xf32> to vector<128xf32>
    %95 = arith.mulf %81, %81 : vector<7x7x128xf32>
    %cst_60 = arith.constant dense<0.000000e+00> : vector<128xf32>
    %96 = vector.multi_reduction <add>, %95, %cst_60 [0, 1] : vector<7x7x128xf32> to vector<128xf32>
    %97 = arith.addf %94, %96 : vector<128xf32>
    %c0_61 = arith.constant 0 : index
    %c0_62 = arith.constant 0 : index
    %98 = vector.load %arg9[%c0_61, %c0_62] : memref<1x128xf32, #tpu.memory_space<vmem>>, vector<1x128xf32>
    %99 = vector.shape_cast %98 : vector<1x128xf32> to vector<128xf32>
    %100 = vector.shape_cast %97 : vector<128xf32> to vector<1x128xf32>
    tpu.vector_store %arg9[%c0_61, %c0_62], %100 {strides = array<i32>} : memref<1x128xf32, #tpu.memory_space<vmem>>, vector<1x128xf32>,
    %c1_i32 = arith.constant 1 : i32
    %101 = arith.cmpi eq, %arg1, %c1_i32 : i32
    %102 = arith.extui %101 : i1 to i32
    %c0_i32_63 = arith.constant 0 : i32
    %103 = arith.cmpi ne, %102, %c0_i32_63 : i32
    scf.if %103 {
      %c0_64 = arith.constant 0 : index
      %c0_65 = arith.constant 0 : index
      %104 = vector.load %arg8[%c0_64, %c0_65] : memref<1x128xf32, #tpu.memory_space<vmem>>, vector<1x128xf32>
      %105 = vector.shape_cast %104 : vector<1x128xf32> to vector<128xf32>
      %cst_66 = arith.constant 0.0102040814 : f32
      %106 = vector.broadcast %cst_66 : f32 to vector<128xf32>
      %107 = arith.mulf %105, %106 : vector<128xf32>
      %c0_67 = arith.constant 0 : index
      %c0_68 = arith.constant 0 : index
      %108 = vector.load %arg9[%c0_67, %c0_68] : memref<1x128xf32, #tpu.memory_space<vmem>>, vector<1x128xf32>
      %109 = vector.shape_cast %108 : vector<1x128xf32> to vector<128xf32>
      %cst_69 = arith.constant 0.0102040814 : f32
      %110 = vector.broadcast %cst_69 : f32 to vector<128xf32>
      %111 = arith.mulf %109, %110 : vector<128xf32>
      %112 = arith.mulf %107, %107 : vector<128xf32>
      %113 = arith.subf %111, %112 : vector<128xf32>
      %cst_70 = arith.constant 0.000000e+00 : f32
      %114 = vector.broadcast %cst_70 : f32 to vector<128xf32>
      %115 = arith.maximumf %113, %114 : vector<128xf32>
      %c0_71 = arith.constant 0 : index
      %c0_72 = arith.constant 0 : index
      %116 = vector.load %arg4[%c0_71, %c0_72] : memref<1x128xf32, #tpu.memory_space<vmem>>, vector<1x128xf32>
      %117 = vector.shape_cast %116 : vector<1x128xf32> to vector<128xf32>
      %cst_73 = arith.constant 1.000000e-03 : f32
      %118 = vector.broadcast %cst_73 : f32 to vector<128xf32>
      %119 = arith.addf %115, %118 : vector<128xf32>
      %120 = math.rsqrt %119 : vector<128xf32>
      %121 = arith.mulf %117, %120 : vector<128xf32>
      %c0_74 = arith.constant 0 : index
      %c0_75 = arith.constant 0 : index
      %122 = vector.load %arg5[%c0_74, %c0_75] : memref<1x128xf32, #tpu.memory_space<vmem>>, vector<1x128xf32>
      %123 = vector.shape_cast %122 : vector<1x128xf32> to vector<128xf32>
      %124 = arith.mulf %107, %121 : vector<128xf32>
      %125 = arith.subf %123, %124 : vector<128xf32>
      %c0_76 = arith.constant 0 : index
      %c0_77 = arith.constant 0 : index
      %c0_78 = arith.constant 0 : index
      %c0_79 = arith.constant 0 : index
      %126 = vector.load %arg7[%c0_76, %c0_77, %c0_78, %c0_79] : memref<2x7x7x128xf32, #tpu.memory_space<vmem>>, vector<2x7x7x128xf32>
      %127 = vector.shape_cast %121 : vector<128xf32> to vector<1x1x1x128xf32>
      %128 = vector.broadcast %127 : vector<1x1x1x128xf32> to vector<2x7x7x128xf32>
      %129 = arith.mulf %126, %128 : vector<2x7x7x128xf32>
      %130 = vector.shape_cast %125 : vector<128xf32> to vector<1x1x1x128xf32>
      %131 = vector.broadcast %130 : vector<1x1x1x128xf32> to vector<2x7x7x128xf32>
      %132 = arith.addf %129, %131 : vector<2x7x7x128xf32>
      %c0_80 = arith.constant 0 : index
      %c0_81 = arith.constant 0 : index
      %c0_82 = arith.constant 0 : index
      %c0_83 = arith.constant 0 : index
      %133 = vector.load %arg6[%c0_80, %c0_81, %c0_82, %c0_83] : memref<2x7x7x128xf32, #tpu.memory_space<vmem>>, vector<2x7x7x128xf32>
      tpu.vector_store %arg6[%c0_80, %c0_81, %c0_82, %c0_83], %132 {strides = array<i32>} : memref<2x7x7x128xf32, #tpu.memory_space<vmem>>, vector<2x7x7x128xf32>,
    } else {
    }
    return
  }
  func.func @transform_0(%arg0: i32, %arg1: i32) -> (i32, i32, i32, i32) {
    %c0_i32 = arith.constant 0 : i32
    %c0_i32_0 = arith.constant 0 : i32
    %c0_i32_1 = arith.constant 0 : i32
    return %arg1, %c0_i32, %c0_i32_0, %arg0 : i32, i32, i32, i32
  }
  func.func @transform_1(%arg0: i32, %arg1: i32) -> (i32, i32, i32) {
    %c0_i32 = arith.constant 0 : i32
    %c0_i32_0 = arith.constant 0 : i32
    %c0_i32_1 = arith.constant 0 : i32
    return %c0_i32, %c0_i32_0, %arg0 : i32, i32, i32
  }
  func.func @transform_2(%arg0: i32, %arg1: i32) -> (i32, i32) {
    %c0_i32 = arith.constant 0 : i32
    %c0_i32_0 = arith.constant 0 : i32
    return %c0_i32, %arg0 : i32, i32
  }
  func.func @transform_3(%arg0: i32, %arg1: i32) -> (i32, i32) {
    %c0_i32 = arith.constant 0 : i32
    %c0_i32_0 = arith.constant 0 : i32
    return %c0_i32, %arg0 : i32, i32
  }
  func.func @transform_4(%arg0: i32, %arg1: i32) -> (i32, i32, i32, i32) {
    %c0_i32 = arith.constant 0 : i32
    %c0_i32_0 = arith.constant 0 : i32
    %c0_i32_1 = arith.constant 0 : i32
    %c0_i32_2 = arith.constant 0 : i32
    return %c0_i32, %c0_i32_0, %c0_i32_1, %arg0 : i32, i32, i32, i32
  }
}

</mosaic_0001>

<bundles_post_ra>
// kernel: depthwise_conv_bn.1
= control target key start
LH: loop header
LB: loop body
LE: loop exit
PB: predicated region body
PF: predicated region fallthrough
CT: control target
= control target key end

     0   :  { %s1754_s0 = inlined_call_operand.vmem [shape: f32[2,7,7,256], index: 0, kind: input, shape index: {}]   ;;  %s1755_s1 = inlined_call_operand.vmem [shape: f32[3,3,256], index: 1, kind: input, shape index: {}]   ;;  %s1756_s2 = inlined_call_operand.vmem [shape: f32[1,256], index: 2, kind: input, shape index: {}]   ;;  %s1757_s3 = inlined_call_operand.vmem [shape: f32[1,256], index: 3, kind: input, shape index: {}]   ;;  %s1758_s4 = inlined_call_operand.vmem [shape: f32[2,7,7,256], index: 4, kind: output, shape index: {}]  }
   0x1   :  { %1759 = sst [smem:[#allocation9_spill]] %s1754_s0 }
   0x2   :  { %s1365_s15 = smov 0   ;;  %s1367_s16 = smov 0  }
   0x3   :  { %s1369_s17 = smov 0   ;;  %s1371_s18 = smov 0  }
   0x4   :  { %s1373_s19 = smov 0   ;;  %s1375_s20 = smov 0  }
   0x5   :  { %s1377_s21 = smov 0   ;;  %s1379_s22 = smov 0  }
   0x6   :  { %s1381_s23 = smov 0  }
   0x7 LB: > { %s23_s24 = sadd.s32 1, %s1328_s21  ;;  %s26_s25 = sadd.s32 1, %s1332_s22  ;;  %s1336_s23 = sphi %s1381_s23, %s14_s23   ;;  %s1332_s22 = sphi %s1379_s22, %s1771_s22   ;;  %s1328_s21 = sphi %s1377_s21, %s1770_s21   ;;  %s1324_s20 = sphi %s1375_s20, %s1769_s20   ;;  %s1320_s19 = sphi %s1373_s19, %s1768_s19   ;;  %s1316_s18 = sphi %s1371_s18, %s1767_s18   ;;  %s1312_s17 = sphi %s1369_s17, %s1766_s17   ;;  %s1308_s16 = sphi %s1367_s16, %s1765_s16   ;;  %s1304_s15 = sphi %s1365_s15, %s1764_s15  }
   0x8   : > { %p24_p0 = scmp.ge.s32.totalorder %s23_s24, 2  ;;  %s1157_s26 = sadd.s32 4294967295, %s1336_s23  }
   0x9   : > { %p42_p1 = scmp.ne.s32.totalorder %s1316_s18, %s1312_s17  ;;  %s35_s27 = sadd.s32 1, %s1316_s18 }
   0xa   : > { %s1773_s24 = smov (%p24_p0, %s23_s24), 0  ;;  %s1775_s25 = smov (!%p24_p0, %s26_s25), %s1332_s22 }
   0xb   : > { %p43_p2 = scmp.eq.s32.totalorder %s1336_s23, 0  ;;  %p28_p3 = scmp.ge.s32.totalorder %s1775_s25, 2 }
   0xc   : > { %s30_s28 = ssub.s32 %s1328_s21, %s1773_s24  ;;  %p68_p5 = scmp.ne.s32.totalorder %s1308_s16, %s1304_s15 }
   0xd   : > { %p1422_p4 = por %p43_p2, %p42_p1  ;;  %s1777_s25 = smov (%p28_p3, %s1775_s25), 0 }
   0xe   : > { %p1430_p6 = por %p68_p5, %p43_p2  ;;  %p150_p7 = scmp.eq.s32.totalorder %s1157_s26, 3 }
   0xf   : > { %s31_s5 = ssub.s32 %s1332_s22, %s1777_s25  ;;  %s61_s6 = sadd.s32 1, %s1308_s16 }
  0x10   : > { %s32_s7 = sor.u32 %s31_s5, %s30_s28  ;;  %p59_p8 = scmp.eq.s32.totalorder %s31_s5, 0 }
  0x11   : > { %p33_p9 = scmp.eq.s32.totalorder %s32_s7, 0  ;;  %p1437_p10 = por %p150_p7, %p68_p5 }
  0x12   : > { %s1442_s9 = scalar_select %p59_p8, %s1308_s16, %s61_s6  }
  0x13   : > { %s1445_s10 = scalar_select %p33_p9, %s1316_s18, %s35_s27  }
  0x14   : > { %p1160_p11 = scmp.ge.s32.totalorder %s1336_s23, 4 }
  0x16   : > { %172 = sbr.rel (%p1160_p11) target bundleno = 47 (0x2f), region = 16 }
  0x1b   : > { %175 = sbr.rel (!%p1422_p4) target bundleno = 40 (0x28), region = 20  ;;  %s177_s11 = sand.u32 (%p1422_p4), 1, %s1316_s18  }
  0x1c   : > { %s1185_s12 = smul.u32 (%p1422_p4), 14, %s1328_s21  ;;  %s1763_s0 = sld [smem:[#allocation9_spill]] (%p1422_p4) }
  0x1d   : > { %s1184_s13 = smul.u32 (%p1422_p4), 56, %s177_s11 }
  0x1e   : > { %s181_s14 = sadd.s32 (%p1422_p4), %s1332_s22, %s1185_s12 }
  0x1f   : > { %s1161_s26 = sshll.u32 (%p1422_p4), %s181_s14, 3  ;;  %s179_s27 = scalar_lea.vmem (%p1422_p4), [#allocation6], %s1184_s13 }
  0x22   : > { %s183_s6 = scalar_lea.vmem %s1763_s0, %s1161_s26 }
  0x23   : > { %v224_v0 = vld [vmem:[%s183_s6] sm:$0xff]  ;;  %v226_v1 = vld [vmem:[%s183_s6 + $0x10] sm:$0xff] }
  0x24   : > { %v228_v2 = vld [vmem:[%s183_s6 + $0x20] sm:$0xff]  ;;  %225 = vst [vmem:[%s179_s27] sm:$0xff] %v224_v0  ;;  %227 = vst [vmem:[%s179_s27 + $0x8] sm:$0xff] %v226_v1  ;;  %v230_v3 = vld [vmem:[%s183_s6 + $0x30] sm:$0xff] }
  0x25   : > { %229 = vst [vmem:[%s179_s27 + $0x10] sm:$0xff] %v228_v2  ;;  %v232_v4 = vld [vmem:[%s183_s6 + $0x40] sm:$0xff]  ;;  %v234_v5 = vld [vmem:[%s183_s6 + $0x50] sm:$0xff]  ;;  %231 = vst [vmem:[%s179_s27 + $0x18] sm:$0xff] %v230_v3 }
  0x26   : > { %233 = vst [vmem:[%s179_s27 + $0x20] sm:$0xff] %v232_v4  ;;  %235 = vst [vmem:[%s179_s27 + $0x28] sm:$0xff] %v234_v5  ;;  %v236_v6 = vld [vmem:[%s183_s6 + $0x60] sm:$0xff] }
  0x27   : > { %237 = vst [vmem:[%s179_s27 + $0x30] sm:$0xff] %v236_v6 }
  0x28 PF: > { %243 = sbr.rel (!%p1430_p6) target bundleno = 47 (0x2f), region = 58  ;;  %s245_s29 = sand.u32 (%p1430_p6), 1, %s1308_s16  }
  0x29   : > { %s1162_s7 = sshll.u32 (%p1430_p6), %s1332_s22, 2  ;;  %s1186_s11 = smul.u32 (%p1430_p6), 12, %s245_s29 }
  0x2a   : > { %s249_s14 = scalar_lea.vmem (%p1430_p6), %s1755_s1, %s1162_s7 }
  0x2b   : > { %v266_v7 = vld [vmem:[%s249_s14] sm:$0xf] (%p1430_p6)  ;;  %v268_v8 = vld [vmem:[%s249_s14 + $0x8] sm:$0xf] (%p1430_p6)  ;;  %v270_v9 = vld [vmem:[%s249_s14 + $0x10] sm:$0xf] (%p1430_p6) }
  0x2c   : > { %s247_s26 = scalar_lea.vmem (%p1430_p6), [#allocation7], %s1186_s11 }
  0x2d   : > { %267 = vst [vmem:[%s247_s26] sm:$0xf] %v266_v7  ;;  %269 = vst [vmem:[%s247_s26 + $0x4] sm:$0xf] %v268_v8 }
  0x2e   : > { %271 = vst [vmem:[%s247_s26 + $0x8] sm:$0xf] %v270_v9 }
  0x2f PF: > { %p1163_p12 = scmp.ge.s32.totalorder %s1336_s23, 1  ;;  %p312_p13 = scmp.lt.s32.totalorder %s1336_s23, 5 }
  0x31   : > { %p313_p0 = pnand %p1163_p12, %p312_p13 }
  0x32   : > { %s319_s30 = sand.u32 (!%p313_p0), 1, %s1312_s17   ;;  %s326_s28 = sand.u32 (!%p313_p0), 1, %s1304_s15  }
  0x33   : > { %316 = sbr.rel (%p313_p0) target bundleno = 220 (0xdc), region = 107  ;;  %p360_p1 = scmp.lt.s32.totalorder (!%p313_p0), %s1324_s20, 1 }
  0x34   : > { %s1187_s5 = smul.u32 (!%p313_p0), 56, %s319_s30  ;;  %p1164_p2 = scmp.ne.s32.totalorder (!%p313_p0), %s1320_s19, 0 }
  0x35   : > { %s1188_s6 = smul.u32 (!%p313_p0), 12, %s326_s28 }
  0x36   : > { %s1189_s27 = smul.u32 (!%p313_p0), 112, %s326_s28  ;;  %s1479_s0 = scalar_lea.vmem (!%p313_p0), [#allocation6], %s1187_s5 }
  0x37   : > { %s1481_s17 = scalar_lea.vmem (!%p313_p0), [#allocation7], %s1188_s6 }
  0x38   : > { %s1469_s29 = scalar_select %p360_p1, %s1324_s20, 1 }
  0x39   : > { %s1483_s15 = scalar_lea.vmem [#allocation8], %s1189_s27  ;;  %369 = sbr.rel (%p1164_p2) target bundleno = 64 (0x40), region = 119 }
  0x3a   : > { %s362_s12 = scalar_lea.vmem %s1756_s2, %s1469_s29  ;;  %s365_s26 = scalar_lea.vmem %s1757_s3, %s1469_s29 }
  0x3e   : > { %v1338_v10 = vmov 0.0  }
  0x3f   : > { %370 = vst [vmem:[#allocation3] sm:$0x1] %v1338_v10  ;;  %371 = vst [vmem:[#allocation4] sm:$0x1] %v1338_v10 }
  0x40 PF: > { %v392_v11 = vld [vmem:[%s1479_s0] sm:$0x7f]  ;;  %v393_v12 = vld [vmem:[%s1479_s0 + $0x8] sm:$0x7f]  ;;  %v1339_v13 = vmov 0.0   ;;  %vm516_vm0 = vcmask 1045504  }
  0x41   : > { %373 = vst [vmem:[#allocation5 + $0x8] sm:$0x1] %v1339_v13  ;;  %376 = vst [vmem:[#allocation5 + $0x88] sm:$0x1] %v1339_v13  ;;  %v394_v14 = vld [vmem:[%s1479_s0 + $0x10] sm:$0x7f] }
  0x42   : > { %378 = vst [vmem:[#allocation5 + $0x10] sm:$0x1] %v1339_v13  ;;  %379 = vst [vmem:[#allocation5 + $0x20] sm:$0x1] %v1339_v13  ;;  %v395_v15 = vld [vmem:[%s1479_s0 + $0x18] sm:$0x7f] }
  0x43   : > { %380 = vst [vmem:[#allocation5 + $0x30] sm:$0x1] %v1339_v13  ;;  %381 = vst [vmem:[#allocation5 + $0x40] sm:$0x1] %v1339_v13  ;;  %v396_v16 = vld [vmem:[%s1479_s0 + $0x20] sm:$0x7f] }
  0x44   : > { %382 = vst [vmem:[#allocation5 + $0x50] sm:$0x1] %v1339_v13  ;;  %383 = vst [vmem:[#allocation5 + $0x60] sm:$0x1] %v1339_v13  ;;  %v397_v17 = vld [vmem:[%s1479_s0 + $0x28] sm:$0x7f] }
  0x45   : > { %384 = vst [vmem:[#allocation5 + $0x70] sm:$0x1] %v1339_v13  ;;  %385 = vst [vmem:[#allocation5 + $0x18] sm:$0x1] %v1339_v13  ;;  %v398_v18 = vld [vmem:[%s1479_s0 + $0x30] sm:$0x7f] }
  0x46   : > { %386 = vst [vmem:[#allocation5 + $0x28] sm:$0x1] %v1339_v13  ;;  %387 = vst [vmem:[#allocation5 + $0x38] sm:$0x1] %v1339_v13  ;;  %v1494_v19 = vld [vmem:[%s1481_s17] ss:$0 sm:$0xff] }
  0x47   : > { %388 = vst [vmem:[#allocation5 + $0x48] sm:$0x1] %v1339_v13  ;;  %389 = vst [vmem:[#allocation5 + $0x58] sm:$0x1] %v1339_v13  ;;  %v1497_v20 = vld [vmem:[%s1481_s17 + $0x1] ss:$0 sm:$0xff] }
  0x48   : > { %390 = vst [vmem:[#allocation5 + $0x68] sm:$0x1] %v1339_v13  ;;  %391 = vst [vmem:[#allocation5 + $0x78] sm:$0x1] %v1339_v13  ;;  %v1500_v21 = vld [vmem:[%s1481_s17 + $0x2] ss:$0 sm:$0xff] }
  0x49   : > { %399 = vst [vmem:[#allocation5 + $0x11] sm:$0x7f] %v392_v11  ;;  %400 = vst [vmem:[#allocation5 + $0x21] sm:$0x7f] %v393_v12  ;;  %v448_v22 = vmul.f32 0.0, %v1497_v20  ;;  %v488_v23 = vmul.f32 0.0, %v1500_v21 }
  0x4a   : > { %401 = vst [vmem:[#allocation5 + $0x31] sm:$0x7f] %v394_v14  ;;  %402 = vst [vmem:[#allocation5 + $0x41] sm:$0x7f] %v395_v15  ;;  %v429_v24 = vmul.f32 0.0, %v1494_v19  ;;  %s808_s0 = smul.u32 56, %s1320_s19 }
  0x4b   : > { %403 = vst [vmem:[#allocation5 + $0x51] sm:$0x7f] %v396_v16  ;;  %404 = vst [vmem:[#allocation5 + $0x61] sm:$0x7f] %v397_v17  ;;  %v462_v25 = vrot.slane %v448_v22, 1  ;;  %v517_v33 = vrot.slane %v488_v23, 2 }
  0x4c   : > { %405 = vst [vmem:[#allocation5 + $0x71] sm:$0x7f] %v398_v18  ;;  %v1506_v26 = vld [vmem:[%s1481_s17 + $0x5] ss:$0 sm:$0xff]  ;;  %v1509_v27 = vld [vmem:[%s1481_s17 + $0x6] ss:$0 sm:$0xff] }
  0x4d   : > { %v407_v28 = vld [vmem:[#allocation5 + $0x8] sm:$0x1]  ;;  %v409_v30 = vld [vmem:[#allocation5 + $0x18] sm:$0x1]  ;;  %v1513_v34 = vld [vmem:[%s1481_s17 + $0x4] ss:$0 sm:$0xff]  ;;  %v476_v35 = vadd.f32 %v462_v25, %v429_v24 }
  0x4e   : > { %v411_v31 = vld [vmem:[#allocation5 + $0x28] sm:$0x1]  ;;  %v489_v32 = vmul.f32 %v1500_v21, %v407_v28  ;;  %v491_v36 = vmul.f32 %v1500_v21, %v409_v30  ;;  %v1518_v38 = vld [vmem:[%s1481_s17 + $0xa] ss:$0 sm:$0xff]  ;;  %v618_v41 = vmul.f32 %v1509_v27, %v409_v30  ;;  %v1527_v45 = vld [vmem:[%s1481_s17 + $0x9] ss:$0 sm:$0xff] }
  0x4f   : > { %v1523_v43 = vmul.f32 %v1500_v21, %v411_v31  ;;  %v620_v47 = vmul.f32 %v1509_v27, %v411_v31  ;;  %v746_v49 = vmul.f32 %v1518_v38, %v411_v31  ;;  %v1537_v59 = vld [vmem:[%s1481_s17 + $0x8] ss:$0 sm:$0xff]  ;;  %v413_v22 = vld [vmem:[#allocation5 + $0x38] sm:$0x1]  ;;  %s1562_s30 = scalar_lea.vmem [#allocation2], %s808_s0  ;;  %vm818_vm1 = vcmask 1046528  }
  0x50   : > { %v408_v29 = vld [vmem:[#allocation5 + $0x10] sm:$0xff]  ;;  %v518_v39 = vrot.slane %v489_v32, 2  ;;  %v410_v42 = vld [vmem:[#allocation5 + $0x20] sm:$0xff]  ;;  %v521_v50 = vrot.slane %v491_v36, 2  ;;  %v646_v55 = vrot.slane %v618_v41, 2  ;;  %v622_v28 = vmul.f32 %v1509_v27, %v413_v22  ;;  %p1180_p3 = scmp.ne.s32.totalorder %s1320_s19, 1 }
  0x51   : > { %v577_v37 = vmul.f32 %v1506_v26, %v408_v29  ;;  %v617_v40 = vmul.f32 %v1509_v27, %v408_v29  ;;  %v558_v44 = vmul.f32 %v1513_v34, %v408_v29  ;;  %v745_v48 = vmul.f32 %v1518_v38, %v410_v42  ;;  %v412_v18 = vld [vmem:[#allocation5 + $0x30] sm:$0xff] }
  0x52   : > { %v519_v46 = vsel %vm516_vm0, %v517_v33, %v518_v39  ;;  %v449_v53 = vmul.f32 %v1497_v20, %v408_v29  ;;  %v705_v56 = vmul.f32 %v1527_v45, %v410_v42  ;;  %v490_v57 = vmul.f32 %v1500_v21, %v408_v29 }
  0x53   : > { %v545_v51 = vadd.f32 %v519_v46, %v476_v35  ;;  %v591_v52 = vrot.slane %v577_v37, 1  ;;  %v645_v54 = vrot.slane %v617_v40, 2  ;;  %v773_v60 = vrot.slane %v745_v48, 2  ;;  %v415_v46 = vld [vmem:[#allocation5 + $0x48] sm:$0x1] }
  0x54   : > { %v430_v61 = vmul.f32 %v1494_v19, %v408_v29  ;;  %v463_v62 = vrot.slane %v449_v53, 1  ;;  %v774_v63 = vrot.slane %v746_v49, 2  ;;  %v520_v0 = vrot.slane %v490_v57, 2  ;;  %v414_v57 = vld [vmem:[#allocation5 + $0x40] sm:$0xff] }
  0x55   : > { %v565_v58 = vadd.f32 %v558_v44, %v545_v51  ;;  %v578_v1 = vmul.f32 %v1506_v26, %v410_v42  ;;  %v619_v2 = vmul.f32 %v1509_v27, %v410_v42  ;;  %v524_v5 = vrot.slane %v1523_v43, 2 }
  0x56   : > { %v477_v4 = vadd.f32 %v463_v62, %v430_v61  ;;  %v647_v6 = vsel %vm516_vm0, %v645_v54, %v646_v55  ;;  %v686_v7 = vmul.f32 %v1537_v59, %v410_v42  ;;  %v522_v8 = vsel %vm516_vm0, %v520_v0, %v521_v50 }
  0x57   : > { %v605_v3 = vadd.f32 %v591_v52, %v565_v58  ;;  %v649_v9 = vrot.slane %v620_v47, 2  ;;  %v559_v12 = vmul.f32 %v1513_v34, %v410_v42  ;;  %v719_v13 = vrot.slane %v705_v56, 1 }
  0x58   : > { %v546_v11 = vadd.f32 %v522_v8, %v477_v4  ;;  %v775_v14 = vsel %vm516_vm0, %v773_v60, %v774_v63  ;;  %v592_v15 = vrot.slane %v578_v1, 1  ;;  %v648_v16 = vrot.slane %v619_v2, 2 }
  0x59   : > { %v673_v10 = vadd.f32 %v647_v6, %v605_v3  ;;  %v431_v24 = vmul.f32 %v1494_v19, %v410_v42  ;;  %v450_v25 = vmul.f32 %v1497_v20, %v410_v42  ;;  %v747_v29 = vmul.f32 %v1518_v38, %v412_v18 }
  0x5a   : > { %v566_v23 = vadd.f32 %v559_v12, %v546_v11  ;;  %v748_v30 = vmul.f32 %v1518_v38, %v413_v22  ;;  %v492_v31 = vmul.f32 %v1500_v21, %v410_v42  ;;  %v706_v35 = vmul.f32 %v1527_v45, %v412_v18 }
  0x5b   : > { %v693_v17 = vadd.f32 %v686_v7, %v673_v10  ;;  %v464_v36 = vrot.slane %v450_v25, 1  ;;  %v650_v37 = vsel %vm516_vm0, %v648_v16, %v649_v9  ;;  %v687_v39 = vmul.f32 %v1537_v59, %v412_v18 }
  0x5c   : > { %v606_v33 = vadd.f32 %v592_v15, %v566_v23  ;;  %v523_v40 = vrot.slane %v492_v31, 2  ;;  %v579_v41 = vmul.f32 %v1506_v26, %v412_v18  ;;  %v621_v48 = vmul.f32 %v1509_v27, %v412_v18 }
  0x5d   : > { %v733_v32 = vadd.f32 %v719_v13, %v693_v17  ;;  %v478_v47 = vadd.f32 %v464_v36, %v431_v24  ;;  %v495_v42 = vmul.f32 %v1500_v21, %v413_v22  ;;  %v776_v49 = vrot.slane %v747_v29, 2 }
  0x5e   : > { %v674_v44 = vadd.f32 %v650_v37, %v606_v33  ;;  %v777_v50 = vrot.slane %v748_v30, 2  ;;  %v525_v51 = vsel %vm516_vm0, %v523_v40, %v524_v5  ;;  %v720_v53 = vrot.slane %v706_v35, 1 }
  0x5f   : > { %v801_v43 = vadd.f32 %v775_v14, %v733_v32  ;;  %v547_v54 = vadd.f32 %v525_v51, %v478_v47  ;;  %v560_v55 = vmul.f32 %v1513_v34, %v412_v18  ;;  %v652_v56 = vrot.slane %v622_v28, 2 }
  0x60   : > { %v694_v52 = vadd.f32 %v687_v39, %v674_v44  ;;  %v1567_v58 = vmul.f32 %v1500_v21, %v415_v46  ;;  %v651_v60 = vrot.slane %v621_v48, 2  ;;  %v593_v63 = vrot.slane %v579_v41, 1  ;;  %v417_v39 = vld [vmem:[#allocation5 + $0x58] sm:$0x1] }
  0x61   : > { %810 = vst [vmem:[%s1562_s30] sm:$0x7f] %v801_v43  ;;  %v567_v62 = vadd.f32 %v560_v55, %v547_v54  ;;  %v749_v0 = vmul.f32 %v1518_v38, %v414_v57  ;;  %v527_v1 = vrot.slane %v495_v42, 2  ;;  %v778_v2 = vsel %vm516_vm0, %v776_v49, %v777_v50 }
  0x62   : > { %v734_v61 = vadd.f32 %v720_v53, %v694_v52  ;;  %v750_v3 = vmul.f32 %v1518_v38, %v415_v46  ;;  %v1573_v4 = vmul.f32 0.0, %v1518_v38  ;;  %v707_v7 = vmul.f32 %v1527_v45, %v414_v57 }
  0x63   : > { %v607_v6 = vadd.f32 %v593_v63, %v567_v62  ;;  %v451_v8 = vmul.f32 %v1497_v20, %v412_v18  ;;  %v530_v9 = vrot.slane %v1567_v58, 2  ;;  %v653_v10 = vsel %vm516_vm0, %v651_v60, %v652_v56 }
  0x64   : > { %v802_v5 = vadd.f32 %v778_v2, %v734_v61  ;;  %v432_v11 = vmul.f32 %v1494_v19, %v412_v18  ;;  %v494_v12 = vmul.f32 %v1500_v21, %v412_v18  ;;  %v624_v13 = vmul.f32 %v1509_v27, %v415_v46  ;;  %v416_v46 = vld [vmem:[#allocation5 + $0x50] sm:$0xff] }
  0x65   : > { %v675_v14 = vadd.f32 %v653_v10, %v607_v6  ;;  %v688_v15 = vmul.f32 %v1537_v59, %v414_v57  ;;  %v779_v16 = vrot.slane %v749_v0, 2  ;;  %v780_v17 = vrot.slane %v750_v3, 2 }
  0x66   : > { %811 = vst [vmem:[%s1562_s30 + $0x8] sm:$0x7f] %v802_v5  ;;  %v465_v22 = vrot.slane %v451_v8, 1  ;;  %v526_v23 = vrot.slane %v494_v12, 2  ;;  %v580_v24 = vmul.f32 %v1506_v26, %v414_v57  ;;  %v841_v25 = vmul.f32 %v801_v43, %v801_v43 }
  0x67   : > { %v695_v28 = vadd.f32 %v688_v15, %v675_v14  ;;  %v721_v29 = vrot.slane %v707_v7, 1  ;;  %v623_v30 = vmul.f32 %v1509_v27, %v414_v57  ;;  %v819_v31 = vsel %vm818_vm1, %v801_v43, 0.0  ;;  %v419_v7 = vld [vmem:[#allocation5 + $0x68] sm:$0x1] }
  0x68   : > { %v479_v18 = vadd.f32 %v465_v22, %v432_v11  ;;  %v528_v32 = vsel %vm516_vm0, %v526_v23, %v527_v1  ;;  %v561_v33 = vmul.f32 %v1513_v34, %v414_v57  ;;  %v820_v35 = vsel %vm818_vm1, %v802_v5, 0.0 }
  0x69   : > { %v655_v36 = vrot.slane %v624_v13, 2  ;;  %v735_v37 = vadd.f32 %v721_v29, %v695_v28  ;;  %v654_v40 = vrot.slane %v623_v30, 2  ;;  %v842_v41 = vmul.f32 %v802_v5, %v802_v5 }
  0x6a   : > { %v781_v44 = vsel %vm516_vm0, %v779_v16, %v780_v17  ;;  %v548_v47 = vadd.f32 %v528_v32, %v479_v18  ;;  %v594_v48 = vrot.slane %v580_v24, 1  ;;  %v848_v43 = vsel %vm818_vm1, %v841_v25, 0.0  ;;  %v418_v25 = vld [vmem:[#allocation5 + $0x60] sm:$0xff] }
  0x6b   : > { %v1592_v42 = vadd.f32 %v781_v44, %v735_v37  ;;  %v751_v49 = vmul.f32 %v1518_v38, %v416_v46  ;;  %v752_v50 = vmul.f32 %v1518_v38, %v417_v39  ;;  %v1597_v51 = vmul.f32 %v1500_v21, %v417_v39 }
  0x6c   : > { %v568_v52 = vadd.f32 %v561_v33, %v548_v47  ;;  %v433_v53 = vmul.f32 %v1494_v19, %v414_v57  ;;  %v452_v54 = vmul.f32 %v1497_v20, %v414_v57  ;;  %v1601_v55 = vadd.f32 %v820_v35, %v819_v31 }
  0x6d   : > { %812 = vst [vmem:[%s1562_s30 + $0x10] sm:$0x7f] %v1592_v42  ;;  %v626_v56 = vmul.f32 %v1509_v27, %v417_v39  ;;  %v656_v58 = vsel %vm516_vm0, %v654_v40, %v655_v36  ;;  %v496_v60 = vmul.f32 %v1500_v21, %v414_v57  ;;  %v849_v61 = vsel %vm818_vm1, %v842_v41, 0.0 }
  0x6e   : > { %v608_v62 = vadd.f32 %v594_v48, %v568_v52  ;;  %v708_v63 = vmul.f32 %v1527_v45, %v416_v46  ;;  %v466_v0 = vrot.slane %v452_v54, 1  ;;  %v689_v1 = vmul.f32 %v1537_v59, %v416_v46 }
  0x6f   : > { %v782_v2 = vrot.slane %v751_v49, 2  ;;  %v783_v3 = vrot.slane %v752_v50, 2  ;;  %v529_v5 = vrot.slane %v496_v60, 2  ;;  %v562_v10 = vmul.f32 %v1513_v34, %v416_v46 }
  0x70   : > { %v676_v6 = vadd.f32 %v656_v58, %v608_v62  ;;  %v480_v8 = vadd.f32 %v466_v0, %v433_v53  ;;  %v581_v11 = vmul.f32 %v1506_v26, %v416_v46  ;;  %v533_v57 = vrot.slane %v1597_v51, 2  ;;  %v421_v62 = vld [vmem:[#allocation5 + $0x78] sm:$0x1] }
  0x71   : > { %v658_v12 = vrot.slane %v626_v56, 2  ;;  %v531_v13 = vsel %vm516_vm0, %v529_v5, %v530_v9  ;;  %v625_v14 = vmul.f32 %v1509_v27, %v416_v46  ;;  %v722_v16 = vrot.slane %v708_v63, 1  ;;  %v420_v56 = vld [vmem:[#allocation5 + $0x70] sm:$0xff] }
  0x72   : > { %v696_v15 = vadd.f32 %v689_v1, %v676_v6  ;;  %v549_v17 = vadd.f32 %v531_v13, %v480_v8  ;;  %v595_v22 = vrot.slane %v581_v11, 1  ;;  %v1616_v23 = vadd.f32 %v849_v61, %v848_v43 }
  0x73   : > { %v784_v24 = vsel %vm516_vm0, %v782_v2, %v783_v3  ;;  %v1620_v28 = vmul.f32 %v1500_v21, %v419_v7  ;;  %v657_v29 = vrot.slane %v625_v14, 2  ;;  %v753_v9 = vmul.f32 %v1518_v38, %v418_v25 }
  0x74   : > { %v736_v30 = vadd.f32 %v722_v16, %v696_v15  ;;  %v569_v31 = vadd.f32 %v562_v10, %v549_v17  ;;  %v754_v18 = vmul.f32 %v1518_v38, %v419_v7  ;;  %v628_v32 = vmul.f32 %v1509_v27, %v419_v7 }
  0x75   : > { %v659_v33 = vsel %vm516_vm0, %v657_v29, %v658_v12  ;;  %v434_v35 = vmul.f32 %v1494_v19, %v416_v46  ;;  %v453_v36 = vmul.f32 %v1497_v20, %v416_v46  ;;  %v709_v40 = vmul.f32 %v1527_v45, %v418_v25 }
  0x76   : > { %v1628_v37 = vadd.f32 %v784_v24, %v736_v30  ;;  %v609_v39 = vadd.f32 %v595_v22, %v569_v31  ;;  %v498_v41 = vmul.f32 %v1500_v21, %v416_v46  ;;  %v690_v44 = vmul.f32 %v1537_v59, %v418_v25 }
  0x77   : > { %v467_v47 = vrot.slane %v453_v36, 1  ;;  %v582_v48 = vmul.f32 %v1506_v26, %v418_v25  ;;  %v627_v43 = vmul.f32 %v1509_v27, %v418_v25  ;;  %v785_v50 = vrot.slane %v753_v9, 2 }
  0x78   : > { %813 = vst [vmem:[%s1562_s30 + $0x18] sm:$0x7f] %v1628_v37  ;;  %v677_v49 = vadd.f32 %v659_v33, %v609_v39  ;;  %v786_v51 = vrot.slane %v754_v18, 2  ;;  %v532_v52 = vrot.slane %v498_v41, 2  ;;  %v822_v53 = vsel %vm818_vm1, %v1592_v42, 0.0 }
  0x79   : > { %v661_v54 = vrot.slane %v628_v32, 2  ;;  %v481_v58 = vadd.f32 %v467_v47, %v434_v35  ;;  %v563_v46 = vmul.f32 %v1513_v34, %v418_v25  ;;  %v723_v61 = vrot.slane %v709_v40, 1  ;;  %v423_v18 = vld [vmem:[#allocation5 + $0x88] sm:$0x1] }
  0x7a   : > { %v697_v60 = vadd.f32 %v690_v44, %v677_v49  ;;  %v534_v63 = vsel %vm516_vm0, %v532_v52, %v533_v57  ;;  %v660_v0 = vrot.slane %v627_v43, 2  ;;  %v843_v1 = vmul.f32 %v1592_v42, %v1592_v42 }
  0x7b   : > { %v536_v2 = vrot.slane %v1620_v28, 2  ;;  %v550_v3 = vadd.f32 %v534_v63, %v481_v58  ;;  %v596_v5 = vrot.slane %v582_v48, 1  ;;  %v787_v7 = vsel %vm516_vm0, %v785_v50, %v786_v51 }
  0x7c   : > { %v737_v6 = vadd.f32 %v723_v61, %v697_v60  ;;  %v710_v8 = vmul.f32 %v1527_v45, %v420_v56  ;;  %v755_v10 = vmul.f32 %v1518_v38, %v420_v56  ;;  %v756_v12 = vmul.f32 %v1518_v38, %v421_v62 }
  0x7d   : > { %v570_v11 = vadd.f32 %v563_v46, %v550_v3  ;;  %v435_v57 = vmul.f32 %v1494_v19, %v418_v25  ;;  %v454_v13 = vmul.f32 %v1497_v20, %v418_v25  ;;  %v630_v14 = vmul.f32 %v1509_v27, %v421_v62 }
  0x7e   : > { %v805_v42 = vadd.f32 %v787_v7, %v737_v6  ;;  %v662_v15 = vsel %vm516_vm0, %v660_v0, %v661_v54  ;;  %v500_v16 = vmul.f32 %v1500_v21, %v418_v25  ;;  %v823_v17 = vadd.f32 %v822_v53, %v1601_v55 }
  0x7f   : > { %v610_v22 = vadd.f32 %v596_v5, %v570_v11  ;;  %v691_v24 = vmul.f32 %v1537_v59, %v420_v56  ;;  %v468_v28 = vrot.slane %v454_v13, 1  ;;  %v788_v29 = vrot.slane %v755_v10, 2 }
  0x80   : > { %814 = vst [vmem:[%s1562_s30 + $0x20] sm:$0x7f] %v805_v42  ;;  %v789_v30 = vrot.slane %v756_v12, 2  ;;  %v535_v31 = vrot.slane %v500_v16, 2  ;;  %v583_v19 = vmul.f32 %v1506_v26, %v420_v56  ;;  %v724_v9 = vrot.slane %v710_v8, 1 }
  0x81   : > { %v678_v20 = vadd.f32 %v662_v15, %v610_v22  ;;  %v482_v32 = vadd.f32 %v468_v28, %v435_v57  ;;  %v564_v33 = vmul.f32 %v1513_v34, %v420_v56  ;;  %v851_v21 = vsel %vm818_vm1, %v843_v1, 0.0 }
  0x82   : > { %v664_v25 = vrot.slane %v630_v14, 2  ;;  %v537_v55 = vsel %vm516_vm0, %v535_v31, %v536_v2  ;;  %v629_v35 = vmul.f32 %v1509_v27, %v420_v56  ;;  %v844_v36 = vmul.f32 %v1628_v37, %v1628_v37 }
  0x83   : > { %v698_v39 = vadd.f32 %v691_v24, %v678_v20  ;;  %v551_v40 = vadd.f32 %v537_v55, %v482_v32  ;;  %v597_v41 = vrot.slane %v583_v19, 1  ;;  %v852_v26 = vadd.f32 %v851_v21, %v1616_v23  ;;  %v840_v19 = vld [vmem:[#allocation4] sm:$0x1] }
  0x84   : > { %v790_v44 = vsel %vm516_vm0, %v788_v29, %v789_v30  ;;  %v663_v47 = vrot.slane %v629_v35, 2  ;;  %v758_v34 = vmul.f32 %v1518_v38, %v423_v18  ;;  %v824_v48 = vsel %vm818_vm1, %v1628_v37, 0.0  ;;  %v817_v29 = vld [vmem:[#allocation3] sm:$0x1] }
  0x85   : > { %v738_v43 = vadd.f32 %v724_v9, %v698_v39  ;;  %v571_v49 = vadd.f32 %v564_v33, %v551_v40  ;;  %v711_v27 = vmul.f32 0.0, %v1527_v45  ;;  %v825_v50 = vadd.f32 %v824_v48, %v823_v17 }
  0x86   : > { %v665_v51 = vsel %vm516_vm0, %v663_v47, %v664_v25  ;;  %v692_v52 = vmul.f32 0.0, %v1537_v59  ;;  %v853_v23 = vsel %vm818_vm1, %v844_v36, 0.0  ;;  %v845_v53 = vmul.f32 %v805_v42, %v805_v42 }
  0x87   : > { %v806_v54 = vadd.f32 %v790_v44, %v738_v43  ;;  %v611_v56 = vadd.f32 %v597_v41, %v571_v49  ;;  %v854_v58 = vadd.f32 %v853_v23, %v852_v26  ;;  %v791_v38 = vrot.slane %v1573_v4, 2 }
  0x88   : > { %v792_v46 = vrot.slane %v758_v34, 2  ;;  %v826_v37 = vsel %vm818_vm1, %v805_v42, 0.0  ;;  %v725_v45 = vrot.slane %v711_v27, 1  ;;  %v855_v62 = vsel %vm818_vm1, %v845_v53, 0.0 }
  0x89   : > { %815 = vst [vmem:[%s1562_s30 + $0x28] sm:$0x7f] %v806_v54  ;;  %v679_v60 = vadd.f32 %v665_v51, %v611_v56  ;;  %v827_v61 = vadd.f32 %v826_v37, %v825_v50  ;;  %v846_v63 = vmul.f32 %v806_v54, %v806_v54  ;;  %v856_v0 = vadd.f32 %v855_v62, %v854_v58 }
  0x8a   : > { %v793_v1 = vsel %vm516_vm0, %v791_v38, %v792_v46  ;;  %v828_v2 = vsel %vm818_vm1, %v806_v54, 0.0 }
  0x8b   : > { %v699_v59 = vadd.f32 %v692_v52, %v679_v60  ;;  %v829_v5 = vadd.f32 %v828_v2, %v827_v61  ;;  %v857_v4 = vsel %vm818_vm1, %v846_v63, 0.0 }
  0x8c   : > { %v858_v7 = vadd.f32 %v857_v4, %v856_v0 }
  0x8d   : > { %v739_v3 = vadd.f32 %v725_v45, %v699_v59 }
  0x8f   : > { %v807_v6 = vadd.f32 %v793_v1, %v739_v3 }
  0x91   : > { %816 = vst [vmem:[%s1562_s30 + $0x30] sm:$0x7f] %v807_v6  ;;  %v830_v8 = vsel %vm818_vm1, %v807_v6, 0.0  ;;  %v847_v10 = vmul.f32 %v807_v6, %v807_v6 }
  0x92   : > { %v831_v11 = vadd.f32 %v830_v8, %v829_v5 }
  0x93   : > { %v859_v12 = vsel %vm818_vm1, %v847_v10, 0.0 }
  0x94   : > { %v832_v57 = vrot.slane %v831_v11, 4  ;;  %v860_v13 = vadd.f32 %v859_v12, %v858_v7 }
  0x96   : > { %v833_v42 = vadd.f32 %v832_v57, %v831_v11  ;;  %v861_v14 = vrot.slane %v860_v13, 4 }
  0x98   : > { %v834_v15 = vrot.slane %v833_v42, 2  ;;  %v862_v16 = vadd.f32 %v861_v14, %v860_v13 }
  0x9a   : > { %v835_v17 = vadd.f32 %v834_v15, %v833_v42  ;;  %v863_v22 = vrot.slane %v862_v16, 2 }
  0x9c   : > { %v836_v24 = vrot.slane %v835_v17, 1  ;;  %v864_v28 = vadd.f32 %v863_v22, %v862_v16 }
  0x9e   : > { %v837_v30 = vadd.f32 %v836_v24, %v835_v17  ;;  %v865_v31 = vrot.slane %v864_v28, 1 }
  0xa0   : > { %v838_v20 = vadd.f32 %v837_v30, %v817_v29  ;;  %v866_v9 = vadd.f32 %v865_v31, %v864_v28  ;;  %872 = sbr.rel (%p1180_p3) target bundleno = 211 (0xd3), region = 123 }
  0xa2   : > { %839 = vst [vmem:[#allocation3] sm:$0x1] %v838_v20  ;;  %v867_v18 = vadd.f32 %v866_v9, %v840_v19 }
  0xa4   : > { %868 = vst [vmem:[#allocation4] sm:$0x1] %v867_v18 }
  0xa5   : > { %v902_v40 = vlaneseq  ;;  %v880_v26 = vld [vmem:[%s362_s12] sm:$0x1]  ;;  %v888_v49 = vld [vmem:[#allocation2 + $0x8] sm:$0x7f]  ;;  %v889_v27 = vld [vmem:[#allocation2 + $0x10] sm:$0x7f] }
  0xa6   : > { %v884_v48 = vld [vmem:[%s365_s26] sm:$0x1]  ;;  %v890_v50 = vld [vmem:[#allocation2 + $0x18] sm:$0x7f]  ;;  %v892_v53 = vld [vmem:[#allocation2 + $0x28] sm:$0x7f] }
  0xa7   : > { %v903_v41 = vshrl.u32 %v902_v40, 7  ;;  %v887_v43 = vld [vmem:[#allocation2] sm:$0x7f]  ;;  %v893_v54 = vld [vmem:[#allocation2 + $0x30] sm:$0x7f] }
  0xa8   : > { %v891_v51 = vld [vmem:[#allocation2 + $0x20] sm:$0x7f]  ;;  %v894_v56 = vld [vmem:[#allocation2 + $0x38] sm:$0x7f]  ;;  %v896_v38 = vld [vmem:[#allocation2 + $0x48] sm:$0x7f] }
  0xa9   : > { %v873_v32 = vld [vmem:[#allocation3] sm:$0x1]  ;;  %v904_v44 = vsub.s32 0, %v903_v41  ;;  %v895_v58 = vld [vmem:[#allocation2 + $0x40] sm:$0x7f] }
  0xaa   : > { %v874_v21 = vmul.f32 0.010204081, %v873_v32  ;;  %v897_v46 = vld [vmem:[#allocation2 + $0x50] sm:$0x7f]  ;;  %v898_v62 = vld [vmem:[#allocation2 + $0x58] sm:$0x7f] }
  0xab   : > { %v875_v33 = vld [vmem:[#allocation4] sm:$0x1]  ;;  %v899_v63 = vld [vmem:[#allocation2 + $0x60] sm:$0x7f]  ;;  %v900_v59 = vld [vmem:[#allocation2 + $0x68] sm:$0x7f] }
  0xac   : > { %v876_v25 = vmul.f32 0.010204081, %v875_v33  ;;  %v877_v55 = vmul.f32 %v874_v21, %v874_v21 }
  0xae   : > { %v878_v35 = vsub.f32 %v876_v25, %v877_v55 }
  0xb0   : > { %v879_v36 = vmax.f32 %v878_v35, 0.0 }
  0xb2   : > { %v881_v39 = vadd.f32 0.001, %v879_v36 }
  0xb4   : > { %1264 = vrsqrt.f32 %v881_v39 }
  0xc1   : > { %v1265_v47 = vpop.eup %1264 }
  0xc2   : > { %v883_v34 = vmul.f32 %v1265_v47, %v880_v26 }
  0xc4   : > { %v885_v52 = vmul.f32 %v883_v34, %v874_v21  ;;  %v905_v23 = vrot.slane %v883_v34, %v904_v44 }
  0xc6   : > { %v886_v37 = vsub.f32 %v884_v48, %v885_v52  ;;  %v907_v60 = vmul.f32 %v905_v23, %v887_v43  ;;  %v908_v45 = vmul.f32 %v905_v23, %v888_v49  ;;  %v909_v61 = vmul.f32 %v905_v23, %v889_v27 }
  0xc7   : > { %v910_v0 = vmul.f32 %v905_v23, %v890_v50  ;;  %v911_v1 = vmul.f32 %v905_v23, %v891_v51  ;;  %v912_v2 = vmul.f32 %v905_v23, %v892_v53  ;;  %v913_v3 = vmul.f32 %v905_v23, %v893_v54 }
  0xc8   : > { %v925_v5 = vrot.slane %v886_v37, %v904_v44  ;;  %v914_v4 = vmul.f32 %v905_v23, %v894_v56  ;;  %v915_v6 = vmul.f32 %v905_v23, %v895_v58  ;;  %v916_v7 = vmul.f32 %v905_v23, %v896_v38 }
  0xc9   : > { %v917_v8 = vmul.f32 %v905_v23, %v897_v46  ;;  %v918_v10 = vmul.f32 %v905_v23, %v898_v62  ;;  %v919_v11 = vmul.f32 %v905_v23, %v899_v63  ;;  %v920_v12 = vmul.f32 %v905_v23, %v900_v59 }
  0xca   : > { %v927_v57 = vadd.f32 %v925_v5, %v907_v60  ;;  %v928_v13 = vadd.f32 %v925_v5, %v908_v45  ;;  %v929_v42 = vadd.f32 %v925_v5, %v909_v61  ;;  %v930_v14 = vadd.f32 %v925_v5, %v910_v0 }
  0xcb   : > { %v931_v15 = vadd.f32 %v925_v5, %v911_v1  ;;  %v932_v16 = vadd.f32 %v925_v5, %v912_v2  ;;  %v933_v17 = vadd.f32 %v925_v5, %v913_v3  ;;  %v934_v22 = vadd.f32 %v925_v5, %v914_v4 }
  0xcc   : > { %941 = vst [vmem:[%s1483_s15] sm:$0x7f] %v927_v57  ;;  %942 = vst [vmem:[%s1483_s15 + $0x8] sm:$0x7f] %v928_v13  ;;  %v935_v24 = vadd.f32 %v925_v5, %v915_v6  ;;  %v936_v28 = vadd.f32 %v925_v5, %v916_v7  ;;  %v937_v29 = vadd.f32 %v925_v5, %v917_v8 }
  0xcd   : > { %943 = vst [vmem:[%s1483_s15 + $0x10] sm:$0x7f] %v929_v42  ;;  %944 = vst [vmem:[%s1483_s15 + $0x18] sm:$0x7f] %v930_v14  ;;  %v938_v30 = vadd.f32 %v925_v5, %v918_v10  ;;  %v939_v31 = vadd.f32 %v925_v5, %v919_v11  ;;  %v940_v19 = vadd.f32 %v925_v5, %v920_v12 }
  0xce   : > { %945 = vst [vmem:[%s1483_s15 + $0x20] sm:$0x7f] %v931_v15  ;;  %946 = vst [vmem:[%s1483_s15 + $0x28] sm:$0x7f] %v932_v16 }
  0xcf   : > { %947 = vst [vmem:[%s1483_s15 + $0x30] sm:$0x7f] %v933_v17  ;;  %948 = vst [vmem:[%s1483_s15 + $0x38] sm:$0x7f] %v934_v22 }
  0xd0   : > { %949 = vst [vmem:[%s1483_s15 + $0x40] sm:$0x7f] %v935_v24  ;;  %950 = vst [vmem:[%s1483_s15 + $0x48] sm:$0x7f] %v936_v28 }
  0xd1   : > { %951 = vst [vmem:[%s1483_s15 + $0x50] sm:$0x7f] %v937_v29  ;;  %952 = vst [vmem:[%s1483_s15 + $0x58] sm:$0x7f] %v938_v30 }
  0xd2   : > { %953 = vst [vmem:[%s1483_s15 + $0x60] sm:$0x7f] %v939_v31  ;;  %954 = vst [vmem:[%s1483_s15 + $0x68] sm:$0x7f] %v940_v19 }
  0xd3 PF: > { %961 = sbr.rel (!%p1437_p10) target bundleno = 220 (0xdc), region = 127  ;;  %s1181_s27 = sshll.u32 (%p1437_p10), %s1324_s20, 3  ;;  %v1018_v20 = vld [vmem:[%s1483_s15] sm:$0xff] (%p1437_p10)  ;;  %v1020_v9 = vld [vmem:[%s1483_s15 + $0x8] sm:$0xff] (%p1437_p10) }
  0xd4   : > { %v1022_v18 = vld [vmem:[%s1483_s15 + $0x10] sm:$0xff] (%p1437_p10)  ;;  %s963_s11 = scalar_lea.vmem (%p1437_p10), %s1758_s4, %s1181_s27  ;;  %v1024_v32 = vld [vmem:[%s1483_s15 + $0x18] sm:$0xff] (%p1437_p10) }
  0xd5   : > { %v1026_v33 = vld [vmem:[%s1483_s15 + $0x20] sm:$0xff] (%p1437_p10)  ;;  %v1028_v21 = vld [vmem:[%s1483_s15 + $0x28] sm:$0xff] (%p1437_p10)  ;;  %1019 = vst [vmem:[%s963_s11] sm:$0xff] (%p1437_p10), %v1018_v20  ;;  %1021 = vst [vmem:[%s963_s11 + $0x10] sm:$0xff] (%p1437_p10), %v1020_v9 }
  0xd6   : > { %1023 = vst [vmem:[%s963_s11 + $0x20] sm:$0xff] (%p1437_p10), %v1022_v18  ;;  %1025 = vst [vmem:[%s963_s11 + $0x30] sm:$0xff] (%p1437_p10), %v1024_v32  ;;  %v1030_v25 = vld [vmem:[%s1483_s15 + $0x30] sm:$0xff] (%p1437_p10)  ;;  %v1032_v55 = vld [vmem:[%s1483_s15 + $0x38] sm:$0xff] (%p1437_p10) }
  0xd7   : > { %1027 = vst [vmem:[%s963_s11 + $0x40] sm:$0xff] (%p1437_p10), %v1026_v33  ;;  %1029 = vst [vmem:[%s963_s11 + $0x50] sm:$0xff] (%p1437_p10), %v1028_v21  ;;  %v1034_v35 = vld [vmem:[%s1483_s15 + $0x40] sm:$0xff] (%p1437_p10)  ;;  %v1036_v36 = vld [vmem:[%s1483_s15 + $0x48] sm:$0xff] (%p1437_p10) }
  0xd8   : > { %1031 = vst [vmem:[%s963_s11 + $0x60] sm:$0xff] %v1030_v25  ;;  %1033 = vst [vmem:[%s963_s11 + $0x70] sm:$0xff] %v1032_v55  ;;  %v1038_v39 = vld [vmem:[%s1483_s15 + $0x50] sm:$0xff]  ;;  %v1040_v40 = vld [vmem:[%s1483_s15 + $0x58] sm:$0xff] }
  0xd9   : > { %1035 = vst [vmem:[%s963_s11 + $0x80] sm:$0xff] %v1034_v35  ;;  %1037 = vst [vmem:[%s963_s11 + $0x90] sm:$0xff] %v1036_v36  ;;  %v1042_v41 = vld [vmem:[%s1483_s15 + $0x60] sm:$0xff]  ;;  %v1044_v26 = vld [vmem:[%s1483_s15 + $0x68] sm:$0xff] }
  0xda   : > { %1039 = vst [vmem:[%s963_s11 + $0xa0] sm:$0xff] %v1038_v39  ;;  %1041 = vst [vmem:[%s963_s11 + $0xb0] sm:$0xff] %v1040_v40 }
  0xdb   : > { %1043 = vst [vmem:[%s963_s11 + $0xc0] sm:$0xff] %v1042_v41  ;;  %1045 = vst [vmem:[%s963_s11 + $0xd0] sm:$0xff] %v1044_v26 }
  0xdc PF: > { %s14_s23 = sadd.s32 1, %s1336_s23   ;;  %s1764_s15 = smov %s1308_s16 }
  0xdd   : > { %p11_p4 = scmp.ge.s32.totalorder %s14_s23, 6   ;;  %s1765_s16 = smov %s1442_s9 }
  0xde   : > { %s1766_s17 = smov %s1316_s18  ;;  %s1767_s18 = smov %s1445_s10 }
  0xdf   : > { %s1768_s19 = smov %s1328_s21  ;;  %s1769_s20 = smov %s1332_s22 }
  0xe0   : > { %s1770_s21 = smov %s1773_s24  ;;  %s1771_s22 = smov %s1777_s25 }
  0xe1   :  { %13 = sbr.rel (!%p11_p4) target bundleno = 7 (0x7), region = 215 }

</bundles_post_ra>
